<compile_context>
chip_gen: v7x
topology: tpu7x:2x2x1
jax: 0.10.0
libtpu: 0.0.40
codegen_flags: <defaults>
</compile_context>

<pallas_src>
import jax
import jax.numpy as jnp
from jax.experimental import pallas as pl
from jax.experimental.pallas import tpu as pltpu


def _round_up(n, m):
    return -(-n // m) * m


def _sublane_pack(dtype):
    # Sub-32-bit dtypes pack along sublanes: f32 -> 8, bf16 -> 16, int8 -> 32.
    return (8 * 4) // jnp.dtype(dtype).itemsize


def _vmem_budgets():
    """(live_vmem_budget_bytes, vmem_limit_bytes) for this TPU generation."""
    cap = None
    try:
        cap = getattr(pltpu.get_tpu_info(), "vmem_capacity_bytes", None)
    except Exception:
        cap = None
    if cap is None or cap <= 80 * 1024 * 1024:
        # v7x-class (64 MiB VMEM per TensorCore) or unknown: stay conservative.
        return 24 * 1024 * 1024, 32 * 1024 * 1024
    # v5e / v6e (128 MiB VMEM): allow larger tiles -> fewer grid steps.
    return 48 * 1024 * 1024, 64 * 1024 * 1024


def _choose_tb(B, per_row_live_bytes, live_budget):
    """Batch rows per grid step, sized from padded live VMEM bytes."""
    # TODO(synk): if a single (1, S, H) row exceeds the live budget (huge S*H),
    # add a grid axis over H ("parallel") or S ("arbitrary" with a VMEM scratch
    # accumulator finalized under pl.when) instead of clamping here.
    max_tb = max(1, live_budget // max(1, per_row_live_bytes))
    # Keep >= 4 grid steps (>= 2 per v7x TensorCore) when the tensor is large
    # enough for DMA/compute pipelining to matter.
    if B * per_row_live_bytes > (8 << 20):
        max_tb = min(max_tb, max(1, B // 4))
    if max_tb >= B:
        return B
    # 2-D block shapes (output tile (tb, H)) want their second-to-last dim to
    # be a multiple of 8 unless it spans the whole axis.
    tb = max(8, (max_tb // 8) * 8)
    return min(tb, B)


def _masked_mean_kernel(x_ref, keep_ref, o_ref):
    # x_ref:    (TB, S, H)  input tile (original dtype)
    # keep_ref: (TB, 1, S)  keep weights in x.dtype; 1 = keep row, 0 = masked out
    # o_ref:    (TB, H)     output tile
    keep = keep_ref[...]
    # Masked sequence-sum on the MXU: per batch row a (1,S) x (S,H) matmul,
    # accumulated in f32. No x*keep temporary is materialized.
    s = jnp.einsum("bms,bsh->bmh", keep, x_ref[...],
                   preferred_element_type=jnp.float32)          # (TB, 1, H) f32
    cnt = jnp.sum(keep, axis=2, dtype=jnp.float32)              # (TB, 1)
    # cnt == 0 -> 0/0 = NaN, matching torch.mean over an empty selection.
    o_ref[...] = (s[:, 0, :] / cnt).astype(o_ref.dtype)


def _mean_kernel(x_ref, o_ref):
    # mask=None path: plain mean over the (static-length) sequence axis.
    s = jnp.sum(x_ref[...], axis=1, dtype=jnp.float32)          # (TB, H)
    o_ref[...] = (s * (1.0 / x_ref.shape[1])).astype(o_ref.dtype)


def masked_pooling(x, mask=None):
    """Pallas implementation of MaskedPooling.forward.

    x:    [B, S, H] float array
    mask: optional [B, S] bool array (True = exclude that row from the mean)
    returns [B, H]
    """
    B, S, H = x.shape
    itemsize = jnp.dtype(x.dtype).itemsize
    pack = _sublane_pack(x.dtype)
    h_lanes = _round_up(H, 128)

    # Padded VMEM bytes per batch row (what the tiles really occupy), counting
    # double-buffering of every pipelined operand plus the f32 result.
    x_row = _round_up(S, pack) * h_lanes * itemsize
    out_row = h_lanes * itemsize
    acc_row = h_lanes * 4
    keep_row = pack * _round_up(S, 128) * itemsize if mask is not None else 0
    per_row_live = 2 * (x_row + keep_row + out_row) + acc_row

    live_budget, vmem_limit = _vmem_budgets()
    tb = _choose_tb(B, per_row_live, live_budget)
    grid = (pl.cdiv(B, tb),)

    compiler_params = pltpu.CompilerParams(
        dimension_semantics=("parallel",),
        vmem_limit_bytes=vmem_limit,
    )
    out_shape = jax.ShapeDtypeStruct((B, H), x.dtype)
    out_spec = pl.BlockSpec((tb, H), lambda b: (b, 0))
    out_bytes = B * H * itemsize

    if mask is None:
        # Specialized path: no zeros mask materialized or DMA'd.
        cost = pl.CostEstimate(
            flops=B * S * H, transcendentals=0,
            bytes_accessed=B * S * H * itemsize + out_bytes)
        return pl.pallas_call(
            _mean_kernel,
            out_shape=out_shape,
            grid_spec=pltpu.PrefetchScalarGridSpec(
                num_scalar_prefetch=0,
                grid=grid,
                in_specs=[pl.BlockSpec((tb, S, H), lambda b: (b, 0, 0))],
                out_specs=out_spec,
            ),
            compiler_params=compiler_params,
            cost_estimate=cost,
        )(x)

    # Lane-dense keep weights [B, 1, S] in x.dtype: S sits on lanes (the MXU K
    # axis), the unit middle dim keeps the tile matmul-ready with no in-kernel
    # relayout, and the VMEM tile is ~pack*roundup(S,128)*itemsize per row
    # instead of the 128x lane-padded [B, S, 1] layout.
    keep = jnp.logical_not(mask).astype(x.dtype).reshape(B, 1, S)

    cost = pl.CostEstimate(
        flops=2 * B * S * H, transcendentals=0,
        bytes_accessed=B * S * H * itemsize + B * S * itemsize + out_bytes)
    return pl.pallas_call(
        _masked_mean_kernel,
        out_shape=out_shape,
        grid_spec=pltpu.PrefetchScalarGridSpec(
            num_scalar_prefetch=0,
            grid=grid,
            in_specs=[
                pl.BlockSpec((tb, S, H), lambda b: (b, 0, 0)),
                pl.BlockSpec((tb, 1, S), lambda b: (b, 0, 0)),
            ],
            out_specs=out_spec,
        ),
        compiler_params=compiler_params,
        cost_estimate=cost,
    )(x, keep)


def _reference(x, mask=None):
    if mask is None:
        return jnp.mean(x, axis=1)
    keep = jnp.logical_not(mask).astype(jnp.float32)    # [B, S]
    cnt = jnp.sum(keep, axis=1, keepdims=True)          # [B, 1]
    return jnp.einsum("bsh,bs->bh", x, keep) / cnt


if __name__ == "__main__":
    key = jax.random.PRNGKey(0)
    B, S, H = 2, 8, 32

    kx, km = jax.random.split(key)
    x = jax.random.normal(kx, (B, S, H), dtype=jnp.float32)
    mask = jax.random.bernoulli(km, p=0.3, shape=(B, S))
    # Guarantee at least one unmasked row per batch element (avoid the NaN
    # empty-selection case in this check).
    mask = mask.at[:, 0].set(False)

    # Masked branch
    out_masked = jax.block_until_ready(masked_pooling(x, mask))
    ref_masked = _reference(x, mask)

    # Unmasked branch (mask=None -> plain mean over dim 1)
    out_plain = jax.block_until_ready(masked_pooling(x, None))
    ref_plain = _reference(x, None)

    assert out_masked.shape == (B, H)
    assert out_plain.shape == (B, H)
    # Exact division restores tight tolerances (no approx reciprocal anymore).
    assert jnp.allclose(out_masked, ref_masked, atol=1e-5, rtol=1e-5)
    assert jnp.allclose(out_plain, ref_plain, atol=1e-5, rtol=1e-5)

    print("KERNEL_OK")
</pallas_src>

<mosaic_0001>
module attributes {stable_mosaic.version = 11 : i64} {
  func.func @_masked_mean_kernel(%arg0: i32, %arg1: memref<2x8x32xf32, #tpu.memory_space<vmem>>, %arg2: memref<2x1x8xf32, #tpu.memory_space<vmem>>, %arg3: memref<2x32xf32, #tpu.memory_space<vmem>>) attributes {dimension_semantics = [#tpu.dimension_semantics<parallel>], iteration_bounds = array<i64: 1>, scalar_prefetch = 0 : i64, scratch_operands = 0 : i64, tpu.core_type = #tpu.core_type<tc>, window_params = [{transform_indices = @transform_0, window_bounds = array<i64: 2, 8, 32>}, {transform_indices = @transform_1, window_bounds = array<i64: 2, 1, 8>}, {transform_indices = @transform_2, window_bounds = array<i64: 2, 32>}]} {
    %c0 = arith.constant 0 : index
    %c0_0 = arith.constant 0 : index
    %c0_1 = arith.constant 0 : index
    %0 = vector.load %arg2[%c0, %c0_0, %c0_1] : memref<2x1x8xf32, #tpu.memory_space<vmem>>, vector<2x1x8xf32>
    %c0_2 = arith.constant 0 : index
    %c0_3 = arith.constant 0 : index
    %c0_4 = arith.constant 0 : index
    %1 = vector.load %arg1[%c0_2, %c0_3, %c0_4] : memref<2x8x32xf32, #tpu.memory_space<vmem>>, vector<2x8x32xf32>
    "tpu.trace_start"() <{level = 10 : i32, message = "bms,bsh->bmh"}> : () -> ()
    %cst = arith.constant dense<0.000000e+00> : vector<2x1x32xf32>
    %2 = tpu.matmul %0, %1, %cst {dimension_numbers = #tpu.dot_dimension_numbers<[2], [1], [1], [2], [0, 0, 0, 1, 1, 2], [0], [0]>} : vector<2x1x8xf32>, vector<2x8x32xf32>, vector<2x1x32xf32> -> vector<2x1x32xf32>
    "tpu.trace_stop"() : () -> ()
    %cst_5 = arith.constant dense<0.000000e+00> : vector<2x1xf32>
    %3 = vector.multi_reduction <add>, %0, %cst_5 [2] : vector<2x1x8xf32> to vector<2x1xf32>
    %4 = vector.shape_cast %2 : vector<2x1x32xf32> to vector<2x32xf32>
    %5 = vector.broadcast %3 : vector<2x1xf32> to vector<2x32xf32>
    %6 = arith.divf %4, %5 : vector<2x32xf32>
    %c0_6 = arith.constant 0 : index
    %c0_7 = arith.constant 0 : index
    %7 = vector.load %arg3[%c0_6, %c0_7] : memref<2x32xf32, #tpu.memory_space<vmem>>, vector<2x32xf32>
    tpu.vector_store %arg3[%c0_6, %c0_7], %6 {strides = array<i32>} : memref<2x32xf32, #tpu.memory_space<vmem>>, vector<2x32xf32>,
    return
  }
  func.func @transform_0(%arg0: i32) -> (i32, i32, i32) {
    %c0_i32 = arith.constant 0 : i32
    %c0_i32_0 = arith.constant 0 : i32
    %c0_i32_1 = arith.constant 0 : i32
    return %arg0, %c0_i32, %c0_i32_0 : i32, i32, i32
  }
  func.func @transform_1(%arg0: i32) -> (i32, i32, i32) {
    %c0_i32 = arith.constant 0 : i32
    %c0_i32_0 = arith.constant 0 : i32
    %c0_i32_1 = arith.constant 0 : i32
    return %arg0, %c0_i32, %c0_i32_0 : i32, i32, i32
  }
  func.func @transform_2(%arg0: i32) -> (i32, i32) {
    %c0_i32 = arith.constant 0 : i32
    %c0_i32_0 = arith.constant 0 : i32
    return %arg0, %c0_i32 : i32, i32
  }
}

</mosaic_0001>

<bundles_post_ra>
// kernel: tpu_custom_call.1
= control target key start
LH: loop header
LB: loop body
LE: loop exit
PB: predicated region body
PF: predicated region fallthrough
CT: control target
= control target key end

     0   :  { %7 = vsyncpa [#allocation3], 0  ;;  %s344_s0 = inlined_call_operand.hbm [shape: f32[2,8,32], index: 0, kind: input, shape index: {}]   ;;  %s345_s1 = inlined_call_operand.vmem [shape: f32[2,1,8], index: 1, kind: input, shape index: {}]   ;;  %s346_s2 = inlined_call_operand.hbm [shape: f32[2,32], index: 2, kind: output, shape index: {}]  }
   0x1   :  { %8 = vsyncpa [#allocation4], 0  ;;  %s293_s9 = smov [#allocation2]   ;;  %s245_s13 = scalar_lea.hbm %s344_s0, 256 }
   0x2   :  { %s14_s10 = sshll.u32 %s293_s9, 4  ;;  %p246_p0 = scmp.ne.s32.totalorder %s344_s0, %s245_s13  ;;  %s15_s10 = int_to_ptr.vmem [resolvable:$true] %s14_s10 }
   0x3   :  { %p249_p1 = scmp.lt.u32.totalorder %s245_s13, %s344_s0 }
   0x5   :  { %p251_p2 = pnand %p249_p1, %p246_p0 }
   0x7   :  { %254 = shalt.err (!%p251_p2)
}
   0x8   :  { %s255_s18 = scalar_lea.vmem %s15_s10, 256  ;;  %p260_p4 = scmp.lt.s32.totalorder %s15_s10, %s15_s10 }
   0x9   :  { %p256_p3 = scmp.ne.s32.totalorder %s15_s10, %s255_s18  ;;  %p261_p5 = scmp.lt.s32.totalorder %s255_s18, %s255_s18 }
   0xb   :  { %p262_p6 = por %p261_p5, %p260_p4 }
   0xd   :  { %p263_p7 = pnand %p262_p6, %p256_p3 }
   0xf   :  { %266 = shalt.err (!%p263_p7)
}
  0x10   :  { %s294_s19 = smov 128   ;;  %s295_s20 = smov 8  }
  0x11   :  { %20 = dma.hbm_to_vmem [thread:$0]  %s344_s0, 256, %s15_s10, [#allocation3], %s294_s19, %s294_s19, %s295_s20  }
  0x12   :  { %289 = dma.done.wait [#allocation3], 256  }
  0x13   :  { %290 = vsyncadd [#allocation3], 4294967040  ;;  %v296_v0 = vmov 0.0   ;;  %vm297_vm0 = vmmov 0   ;;  %vm177_vm1 = vcmask 57344   ;;  %vm30_vm2 = vcmask 64512  }
  0x14   :  { %230 = vmatprep.subr.mxu1 %v296_v0  ;;  %225 = vmatprep.subr.mxu0 %v296_v0  ;;  %v29_v1 = vld [vmem:[#allocation2 + $0x8] sm:$0xff]  ;;  %v28_v2 = vld [vmem:[#allocation2] sm:$0xff]  ;;  %v184_v7 = vlaneseq  ;;  %vm199_vm3 = vcmask 1041409   ;;  %vm202_vm4 = vcmask 254976  }
  0x15   :  { %232 = vmatprep.mubr.msk.f32.mxu1 %vm297_vm0, %v296_v0  ;;  %227 = vmatprep.mubr.msk.f32.mxu0 %vm297_vm0, %v296_v0  ;;  %v27_v3 = vld [vmem:[%s345_s1 + $0x1] sm:$0x1]  ;;  %v26_v4 = vld [vmem:[%s345_s1] sm:$0x1]  ;;  %s298_s1 = smov [#allocation5]  }
  0x16   :  { %231 = vmatpush3.msra.mxu1 %v29_v1  ;;  %226 = vmatpush3.msra.mxu0 %v28_v2  ;;  %v181_v5 = vsel %vm177_vm1, %v27_v3, 0.0  ;;  %v178_v6 = vsel %vm177_vm1, %v26_v4, 0.0  ;;  %v185_v9 = vshrl.u32 %v184_v7, 7  ;;  %s210_s26 = sshll.u32 %s298_s1, 4  ;;  %s211_s26 = int_to_ptr.vmem [resolvable:$true] %s210_s26 }
  0x17   :  { %233 = vmatmul.mubr.msk.f32.vlgmr.msra.gmra.mrb[0].mxu1 %vm30_vm2, %v27_v3  ;;  %228 = vmatmul.mubr.msk.f32.vlgmr.msra.gmra.mrb[0].mxu0 %vm30_vm2, %v26_v4  ;;  %s267_s27 = scalar_lea.vmem %s211_s26, 32  ;;  %p272_p9 = scmp.lt.s32.totalorder %s211_s26, %s211_s26 }
  0x18   :  { %182 = vadd.xlane.f32.xlu0 %v181_v5  ;;  %v186_v11 = vsub.s32 0, %v185_v9  ;;  %p268_p8 = scmp.ne.s32.totalorder %s211_s26, %s267_s27  ;;  %p273_p10 = scmp.lt.s32.totalorder %s267_s27, %s267_s27 }
  0x1a   :  { %p274_p11 = por %p273_p10, %p272_p9 }
  0x1c   :  { %179 = vadd.xlane.f32.xlu0 %v178_v6  ;;  %p275_p12 = pnand %p274_p11, %p268_p8 }
  0xa5   :  { %v183_v8 = vpop.xlane.xlu0 %182 }
  0xa6   :  { %v191_v13 = vrot.slane %v183_v8, %v186_v11 }
  0xa9   :  { %v180_v10 = vpop.xlane.xlu0 %179 }
  0xaa   :  { %v187_v12 = vrot.slane %v180_v10, %v186_v11 }
  0xac   :  { %241 = vrcp.f32 %v187_v12 }
  0xad   :  { %243 = vrcp.f32 %v191_v13 }
  0xb6   :  { %v242_v14 = vpop.eup %241 }
  0xb7   :  { %v244_v15 = vpop.eup %243 }
  0xea   :  { %v173_v16 = vpop.f32.mrb[0].mxu1  ;;  %v100_v17 = vpop.f32.mrb[0].mxu0 }
  0xeb   :  { %v195_v18 = vmul.f32 %v244_v15, %v173_v16  ;;  %v193_v19 = vmul.f32 %v242_v14, %v100_v17  ;;  %v234_v20 = vpop.f32.mrb[1].mxu1  ;;  %v229_v21 = vpop.f32.mrb[1].mxu0 }
  0xed   :  { %v198_v22 = vrot.slane %v195_v18, 7 }
  0xef   :  { %v200_v23 = vsel %vm199_vm3, %v198_v22, %v193_v19 }
  0xf0   :  { %203 = vst.msk [vmem:[#allocation5] sm:$0x3] %vm202_vm4, %v200_v23 }
  0xf1   :  { %278 = shalt.err (!%p275_p12)
}
  0xf2   :  { %s279_s30 = scalar_lea.hbm %s346_s2, 32 }
  0xf3   :  { %p280_p13 = scmp.ne.s32.totalorder %s346_s2, %s279_s30  ;;  %p283_p0 = scmp.lt.u32.totalorder %s279_s30, %s346_s2 }
  0xf5   :  { %p285_p1 = pnand %p283_p0, %p280_p13 }
  0xf7   :  { %288 = shalt.err (!%p285_p1)
}
  0xf8   :  { %213 = dma.vmem_to_hbm [thread:$0]  %s211_s26, 32, %s346_s2, [#allocation4]  }
  0xf9   :  { %291 = dma.done.wait [#allocation4], 32  }
  0xfa   :  { %292 = vsyncadd [#allocation4], 4294967264 }
  0xfb   :  { %217 = vsyncpa [#allocation3], 1 }
  0xfc   :  { %218 = vsyncpa [#allocation4], 1 }

</bundles_post_ra>
